<compile_context>
chip_gen: v7x
topology: tpu7x:2x2x1
jax: 0.10.0
libtpu: 0.0.40
codegen_flags: <defaults>
</compile_context>

<pallas_src>
import math
from functools import partial

import jax
import jax.numpy as jnp
from jax.experimental import pallas as pl
from jax.experimental.pallas import tpu as pltpu


def _lambertw_principal(z):
    """Real principal-branch Lambert W for z >= -1/e (float32).

    Seed: branch-point series for z < 0, log(1+z) for z >= 0, refined with
    3 unrolled Halley steps (one divide per step).  Accurate to f32 precision
    for the practical domain of this loss (|z| up to O(100)).
    """
    e = math.e
    q = jnp.maximum(2.0 * (e * z + 1.0), 0.0)
    p = jnp.sqrt(q)
    # Branch-point series in Horner form.
    w_series = -1.0 + p * (1.0 + p * (-1.0 / 3.0 + p * (11.0 / 72.0)))
    w = jnp.where(z < 0.0, w_series, jnp.log(jnp.maximum(1.0 + z, 1e-30)))
    near_branch = q < 1e-3          # Halley is ill-conditioned at the branch point
    for _ in range(3):              # unrolled Halley, single fused divide per step
        ew = jnp.exp(w)
        wp1 = w + 1.0
        f = w * ew - z
        num = 2.0 * f * wp1
        den = 2.0 * ew * wp1 * wp1 - (w + 2.0) * f
        den = jnp.where(jnp.abs(den) < 1e-20,
                        jnp.where(den < 0.0, -1e-20, 1e-20), den)
        w = w - num / den
    return jnp.where(near_branch, w_series, w)


def _superloss_kernel(tau_ref, loss_ref, out_ref, *, lam):
    loss = loss_ref[...]                      # (tile_rows, 128) f32
    tau_t = tau_ref[...]                      # (1, 1) f32 -> broadcasts

    centered = loss - tau_t
    half_inv_lam = 0.5 / lam                  # trace-time Python constants
    half_gamma = 0.5 * (-2.0 / math.e + 1e-12)
    x = jnp.maximum(centered * half_inv_lam, half_gamma)

    w = _lambertw_principal(x)
    # sigma = exp(-W(x)) == W(x) / x identically; guard x ~ 0 (sigma -> 1).
    small = jnp.abs(x) < 1e-6
    x_safe = jnp.where(small, 1.0, x)
    sigma = jnp.where(small, 1.0 - w, w / x_safe)
    log_sigma = -w                            # log(sigma) exactly

    super_loss = centered * sigma + lam * log_sigma * log_sigma
    # Lane-dense per-tile partial sums (sublane reduce only); wrapper finishes.
    out_ref[...] = jnp.sum(super_loss, axis=0, keepdims=True)


def _pick_tile_rows(rows, max_tile_rows):
    """Largest divisor of `rows` <= cap, preferring multiples of 8 (sublane)."""
    cap = max(1, min(rows, max_tile_rows))
    fallback = 1
    for d in range(cap, 0, -1):
        if rows % d:
            continue
        if d == rows or d % 8 == 0:
            return d
        if fallback == 1:
            fallback = d
    return fallback


@partial(jax.jit, static_argnames=("tau", "lam", "fac", "max_tile_rows"))
def superloss_forward(loss, tau=0.0, lam=1.0, fac=0.9, max_tile_rows=2048):
    """Pallas-backed Superloss.forward: returns the mean super-loss (f32)."""
    n = loss.shape[0]
    assert n % 128 == 0, "demo wrapper requires N to be a multiple of 128"
    # TODO(synk): ragged N would need a masked tail tile; the reference module
    # has no shape constraint, this wrapper requires N % 128 == 0.
    rows = n // 128
    loss2d = loss.reshape(rows, 128).astype(jnp.float32)

    # tau update (trace-time branches on Python floats, like the module).
    loss_mean = jnp.mean(loss2d)
    tau_t = loss_mean if tau == 0.0 else jnp.float32(tau)
    if fac > 0.0:
        tau_t = fac * tau_t + (1.0 - fac) * loss_mean
    tau_arr = jnp.reshape(tau_t, (1, 1)).astype(jnp.float32)

    tile_rows = _pick_tile_rows(rows, max_tile_rows)
    num_tiles = rows // tile_rows

    kernel = partial(_superloss_kernel, lam=float(lam))
    partials = pl.pallas_call(
        kernel,
        out_shape=jax.ShapeDtypeStruct((num_tiles, 128), jnp.float32),
        grid=(num_tiles,),
        in_specs=[
            pl.BlockSpec((1, 1), lambda i: (0, 0)),            # tau_t scalar
            pl.BlockSpec((tile_rows, 128), lambda i: (i, 0)),  # loss tile
        ],
        out_specs=pl.BlockSpec((1, 128), lambda i: (i, 0)),
        compiler_params=pltpu.CompilerParams(
            dimension_semantics=("parallel",)),
    )(tau_arr, loss2d)
    return jnp.sum(partials) / jnp.float32(n)


# ----------------------------------------------------------------------------
# Pure-JAX reference (independent, higher-iteration Lambert W, exp(-W) path).
# ----------------------------------------------------------------------------
def _lambertw_ref(z, iters=20):
    e = math.e
    q = jnp.maximum(2.0 * (e * z + 1.0), 0.0)
    p = jnp.sqrt(q)
    w_series = -1.0 + p * (1.0 + p * (-1.0 / 3.0 + p * (11.0 / 72.0)))
    w = jnp.where(z < 0.0, w_series, jnp.log(jnp.maximum(1.0 + z, 1e-30)))
    for _ in range(iters):
        ew = jnp.exp(w)
        f = w * ew - z
        wp1 = w + 1.0
        denom = ew * wp1 - (w + 2.0) * f / (2.0 * wp1)
        denom = jnp.where(jnp.abs(denom) < 1e-20,
                          jnp.where(denom < 0.0, -1e-20, 1e-20), denom)
        w = w - f / denom
    return jnp.where(q < 1e-3, w_series, w)


def _superloss_reference(loss, tau=0.0, lam=1.0, fac=0.9):
    loss = loss.astype(jnp.float32)
    loss_mean = jnp.mean(loss)
    tau_t = loss_mean if tau == 0.0 else jnp.float32(tau)
    if fac > 0.0:
        tau_t = fac * tau_t + (1.0 - fac) * loss_mean
    beta = (loss - tau_t) / lam
    gamma = -2.0 / math.e + 1e-12
    w = _lambertw_ref(0.5 * jnp.maximum(beta, gamma))
    sigma = jnp.exp(-w)
    return jnp.mean((loss - tau_t) * sigma + lam * jnp.log(sigma) ** 2)


if __name__ == "__main__":
    key = jax.random.PRNGKey(0)
    n = 4096  # per-sample losses (e.g. a batch of cross-entropy values)
    loss = jax.random.uniform(key, (n,), dtype=jnp.float32,
                              minval=0.05, maxval=3.0)

    # Default config (tau auto-set from the batch mean, like the module).
    out = jax.block_until_ready(superloss_forward(loss, tau=0.0, lam=1.0, fac=0.9))
    ref = _superloss_reference(loss, tau=0.0, lam=1.0, fac=0.9)
    assert jnp.allclose(out, ref, rtol=1e-4, atol=1e-5), (out, ref)

    # Multi-tile path: force a 4-step "parallel" grid with per-tile partials.
    out_tiled = jax.block_until_ready(
        superloss_forward(loss, tau=0.0, lam=1.0, fac=0.9, max_tile_rows=8))
    assert jnp.allclose(out_tiled, ref, rtol=1e-4, atol=1e-5), (out_tiled, ref)

    # Fixed-tau / no-EMA branch.
    out2 = jax.block_until_ready(superloss_forward(loss, tau=0.5, lam=2.0, fac=0.0))
    ref2 = _superloss_reference(loss, tau=0.5, lam=2.0, fac=0.0)
    assert jnp.allclose(out2, ref2, rtol=1e-4, atol=1e-5), (out2, ref2)

    print("KERNEL_OK")
</pallas_src>

<mosaic_0001>
module attributes {stable_mosaic.version = 11 : i64} {
  func.func @_superloss_kernel(%arg0: i32, %arg1: memref<1x1xf32, #tpu.memory_space<vmem>>, %arg2: memref<32x128xf32, #tpu.memory_space<vmem>>, %arg3: memref<1x128xf32, #tpu.memory_space<vmem>>) attributes {dimension_semantics = [#tpu.dimension_semantics<parallel>], iteration_bounds = array<i64: 1>, scalar_prefetch = 0 : i64, scratch_operands = 0 : i64, tpu.core_type = #tpu.core_type<tc>, window_params = [{pipeline_mode = #tpu.pipeline_mode<synchronous>, transform_indices = @transform_0, window_bounds = array<i64: 1, 1>}, {transform_indices = @transform_1, window_bounds = array<i64: 32, 128>}, {transform_indices = @transform_2, window_bounds = array<i64: 1, 128>}]} {
    %c0 = arith.constant 0 : index
    %c0_0 = arith.constant 0 : index
    %0 = vector.load %arg2[%c0, %c0_0] : memref<32x128xf32, #tpu.memory_space<vmem>>, vector<32x128xf32>
    %c0_1 = arith.constant 0 : index
    %c0_2 = arith.constant 0 : index
    %1 = vector.load %arg1[%c0_1, %c0_2] : memref<1x1xf32, #tpu.memory_space<vmem>>, vector<1x1xf32>
    %2 = vector.broadcast %1 : vector<1x1xf32> to vector<32x128xf32>
    %3 = arith.subf %0, %2 : vector<32x128xf32>
    %cst = arith.constant 5.000000e-01 : f32
    %4 = vector.broadcast %cst : f32 to vector<32x128xf32>
    %5 = arith.mulf %3, %4 : vector<32x128xf32>
    %cst_3 = arith.constant -0.36787945 : f32
    %6 = vector.broadcast %cst_3 : f32 to vector<32x128xf32>
    %7 = arith.maximumf %5, %6 : vector<32x128xf32>
    %cst_4 = arith.constant 2.71828175 : f32
    %8 = vector.broadcast %cst_4 : f32 to vector<32x128xf32>
    %9 = arith.mulf %8, %7 : vector<32x128xf32>
    %cst_5 = arith.constant 1.000000e+00 : f32
    %10 = vector.broadcast %cst_5 : f32 to vector<32x128xf32>
    %11 = arith.addf %9, %10 : vector<32x128xf32>
    %cst_6 = arith.constant 2.000000e+00 : f32
    %12 = vector.broadcast %cst_6 : f32 to vector<32x128xf32>
    %13 = arith.mulf %12, %11 : vector<32x128xf32>
    %cst_7 = arith.constant 0.000000e+00 : f32
    %14 = vector.broadcast %cst_7 : f32 to vector<32x128xf32>
    %15 = arith.maximumf %13, %14 : vector<32x128xf32>
    %16 = math.sqrt %15 : vector<32x128xf32>
    %cst_8 = arith.constant 0.152777776 : f32
    %17 = vector.broadcast %cst_8 : f32 to vector<32x128xf32>
    %18 = arith.mulf %16, %17 : vector<32x128xf32>
    %cst_9 = arith.constant -0.333333343 : f32
    %19 = vector.broadcast %cst_9 : f32 to vector<32x128xf32>
    %20 = arith.addf %19, %18 : vector<32x128xf32>
    %21 = arith.mulf %16, %20 : vector<32x128xf32>
    %cst_10 = arith.constant 1.000000e+00 : f32
    %22 = vector.broadcast %cst_10 : f32 to vector<32x128xf32>
    %23 = arith.addf %22, %21 : vector<32x128xf32>
    %24 = arith.mulf %16, %23 : vector<32x128xf32>
    %cst_11 = arith.constant -1.000000e+00 : f32
    %25 = vector.broadcast %cst_11 : f32 to vector<32x128xf32>
    %26 = arith.addf %25, %24 : vector<32x128xf32>
    %cst_12 = arith.constant 0.000000e+00 : f32
    %27 = vector.broadcast %cst_12 : f32 to vector<32x128xf32>
    %28 = arith.cmpf olt, %7, %27 : vector<32x128xf32>
    %cst_13 = arith.constant 1.000000e+00 : f32
    %29 = vector.broadcast %cst_13 : f32 to vector<32x128xf32>
    %30 = arith.addf %29, %7 : vector<32x128xf32>
    %cst_14 = arith.constant 1.000000e-30 : f32
    %31 = vector.broadcast %cst_14 : f32 to vector<32x128xf32>
    %32 = arith.maximumf %30, %31 : vector<32x128xf32>
    %33 = math.log %32 : vector<32x128xf32>
    %34 = arith.select %28, %26, %33 : vector<32x128xi1>, vector<32x128xf32>
    %cst_15 = arith.constant 1.000000e-03 : f32
    %35 = vector.broadcast %cst_15 : f32 to vector<32x128xf32>
    %36 = arith.cmpf olt, %15, %35 : vector<32x128xf32>
    %37 = math.exp %34 : vector<32x128xf32>
    %cst_16 = arith.constant 1.000000e+00 : f32
    %38 = vector.broadcast %cst_16 : f32 to vector<32x128xf32>
    %39 = arith.addf %34, %38 : vector<32x128xf32>
    %40 = arith.mulf %34, %37 : vector<32x128xf32>
    %41 = arith.subf %40, %7 : vector<32x128xf32>
    %cst_17 = arith.constant 2.000000e+00 : f32
    %42 = vector.broadcast %cst_17 : f32 to vector<32x128xf32>
    %43 = arith.mulf %42, %41 : vector<32x128xf32>
    %44 = arith.mulf %43, %39 : vector<32x128xf32>
    %cst_18 = arith.constant 2.000000e+00 : f32
    %45 = vector.broadcast %cst_18 : f32 to vector<32x128xf32>
    %46 = arith.mulf %45, %37 : vector<32x128xf32>
    %47 = arith.mulf %46, %39 : vector<32x128xf32>
    %48 = arith.mulf %47, %39 : vector<32x128xf32>
    %cst_19 = arith.constant 2.000000e+00 : f32
    %49 = vector.broadcast %cst_19 : f32 to vector<32x128xf32>
    %50 = arith.addf %34, %49 : vector<32x128xf32>
    %51 = arith.mulf %50, %41 : vector<32x128xf32>
    %52 = arith.subf %48, %51 : vector<32x128xf32>
    %53 = math.absf %52 : vector<32x128xf32>
    %cst_20 = arith.constant 9.99999968E-21 : f32
    %54 = vector.broadcast %cst_20 : f32 to vector<32x128xf32>
    %55 = arith.cmpf olt, %53, %54 : vector<32x128xf32>
    %cst_21 = arith.constant 0.000000e+00 : f32
    %56 = vector.broadcast %cst_21 : f32 to vector<32x128xf32>
    %57 = arith.cmpf olt, %52, %56 : vector<32x128xf32>
    %cst_22 = arith.constant -9.99999968E-21 : f32
    %cst_23 = arith.constant 9.99999968E-21 : f32
    %58 = vector.broadcast %cst_22 : f32 to vector<32x128xf32>
    %59 = vector.broadcast %cst_23 : f32 to vector<32x128xf32>
    %60 = arith.select %57, %58, %59 : vector<32x128xi1>, vector<32x128xf32>
    %61 = arith.select %55, %60, %52 : vector<32x128xi1>, vector<32x128xf32>
    %62 = arith.divf %44, %61 : vector<32x128xf32>
    %63 = arith.subf %34, %62 : vector<32x128xf32>
    %64 = math.exp %63 : vector<32x128xf32>
    %cst_24 = arith.constant 1.000000e+00 : f32
    %65 = vector.broadcast %cst_24 : f32 to vector<32x128xf32>
    %66 = arith.addf %63, %65 : vector<32x128xf32>
    %67 = arith.mulf %63, %64 : vector<32x128xf32>
    %68 = arith.subf %67, %7 : vector<32x128xf32>
    %cst_25 = arith.constant 2.000000e+00 : f32
    %69 = vector.broadcast %cst_25 : f32 to vector<32x128xf32>
    %70 = arith.mulf %69, %68 : vector<32x128xf32>
    %71 = arith.mulf %70, %66 : vector<32x128xf32>
    %cst_26 = arith.constant 2.000000e+00 : f32
    %72 = vector.broadcast %cst_26 : f32 to vector<32x128xf32>
    %73 = arith.mulf %72, %64 : vector<32x128xf32>
    %74 = arith.mulf %73, %66 : vector<32x128xf32>
    %75 = arith.mulf %74, %66 : vector<32x128xf32>
    %cst_27 = arith.constant 2.000000e+00 : f32
    %76 = vector.broadcast %cst_27 : f32 to vector<32x128xf32>
    %77 = arith.addf %63, %76 : vector<32x128xf32>
    %78 = arith.mulf %77, %68 : vector<32x128xf32>
    %79 = arith.subf %75, %78 : vector<32x128xf32>
    %80 = math.absf %79 : vector<32x128xf32>
    %cst_28 = arith.constant 9.99999968E-21 : f32
    %81 = vector.broadcast %cst_28 : f32 to vector<32x128xf32>
    %82 = arith.cmpf olt, %80, %81 : vector<32x128xf32>
    %cst_29 = arith.constant 0.000000e+00 : f32
    %83 = vector.broadcast %cst_29 : f32 to vector<32x128xf32>
    %84 = arith.cmpf olt, %79, %83 : vector<32x128xf32>
    %cst_30 = arith.constant -9.99999968E-21 : f32
    %cst_31 = arith.constant 9.99999968E-21 : f32
    %85 = vector.broadcast %cst_30 : f32 to vector<32x128xf32>
    %86 = vector.broadcast %cst_31 : f32 to vector<32x128xf32>
    %87 = arith.select %84, %85, %86 : vector<32x128xi1>, vector<32x128xf32>
    %88 = arith.select %82, %87, %79 : vector<32x128xi1>, vector<32x128xf32>
    %89 = arith.divf %71, %88 : vector<32x128xf32>
    %90 = arith.subf %63, %89 : vector<32x128xf32>
    %91 = math.exp %90 : vector<32x128xf32>
    %cst_32 = arith.constant 1.000000e+00 : f32
    %92 = vector.broadcast %cst_32 : f32 to vector<32x128xf32>
    %93 = arith.addf %90, %92 : vector<32x128xf32>
    %94 = arith.mulf %90, %91 : vector<32x128xf32>
    %95 = arith.subf %94, %7 : vector<32x128xf32>
    %cst_33 = arith.constant 2.000000e+00 : f32
    %96 = vector.broadcast %cst_33 : f32 to vector<32x128xf32>
    %97 = arith.mulf %96, %95 : vector<32x128xf32>
    %98 = arith.mulf %97, %93 : vector<32x128xf32>
    %cst_34 = arith.constant 2.000000e+00 : f32
    %99 = vector.broadcast %cst_34 : f32 to vector<32x128xf32>
    %100 = arith.mulf %99, %91 : vector<32x128xf32>
    %101 = arith.mulf %100, %93 : vector<32x128xf32>
    %102 = arith.mulf %101, %93 : vector<32x128xf32>
    %cst_35 = arith.constant 2.000000e+00 : f32
    %103 = vector.broadcast %cst_35 : f32 to vector<32x128xf32>
    %104 = arith.addf %90, %103 : vector<32x128xf32>
    %105 = arith.mulf %104, %95 : vector<32x128xf32>
    %106 = arith.subf %102, %105 : vector<32x128xf32>
    %107 = math.absf %106 : vector<32x128xf32>
    %cst_36 = arith.constant 9.99999968E-21 : f32
    %108 = vector.broadcast %cst_36 : f32 to vector<32x128xf32>
    %109 = arith.cmpf olt, %107, %108 : vector<32x128xf32>
    %cst_37 = arith.constant 0.000000e+00 : f32
    %110 = vector.broadcast %cst_37 : f32 to vector<32x128xf32>
    %111 = arith.cmpf olt, %106, %110 : vector<32x128xf32>
    %cst_38 = arith.constant -9.99999968E-21 : f32
    %cst_39 = arith.constant 9.99999968E-21 : f32
    %112 = vector.broadcast %cst_38 : f32 to vector<32x128xf32>
    %113 = vector.broadcast %cst_39 : f32 to vector<32x128xf32>
    %114 = arith.select %111, %112, %113 : vector<32x128xi1>, vector<32x128xf32>
    %115 = arith.select %109, %114, %106 : vector<32x128xi1>, vector<32x128xf32>
    %116 = arith.divf %98, %115 : vector<32x128xf32>
    %117 = arith.subf %90, %116 : vector<32x128xf32>
    %118 = arith.select %36, %26, %117 : vector<32x128xi1>, vector<32x128xf32>
    %119 = math.absf %7 : vector<32x128xf32>
    %cst_40 = arith.constant 9.99999997E-7 : f32
    %120 = vector.broadcast %cst_40 : f32 to vector<32x128xf32>
    %121 = arith.cmpf olt, %119, %120 : vector<32x128xf32>
    %cst_41 = arith.constant 1.000000e+00 : f32
    %122 = vector.broadcast %cst_41 : f32 to vector<32x128xf32>
    %123 = arith.select %121, %122, %7 : vector<32x128xi1>, vector<32x128xf32>
    %cst_42 = arith.constant 1.000000e+00 : f32
    %124 = vector.broadcast %cst_42 : f32 to vector<32x128xf32>
    %125 = arith.subf %124, %118 : vector<32x128xf32>
    %126 = arith.divf %118, %123 : vector<32x128xf32>
    %127 = arith.select %121, %125, %126 : vector<32x128xi1>, vector<32x128xf32>
    %cst_43 = arith.constant 0.000000e+00 : f32
    %128 = vector.broadcast %cst_43 : f32 to vector<32x128xf32>
    %129 = arith.subf %128, %118 : vector<32x128xf32>
    %130 = arith.mulf %3, %127 : vector<32x128xf32>
    %cst_44 = arith.constant 1.000000e+00 : f32
    %131 = vector.broadcast %cst_44 : f32 to vector<32x128xf32>
    %132 = arith.mulf %131, %129 : vector<32x128xf32>
    %133 = arith.mulf %132, %129 : vector<32x128xf32>
    %134 = arith.addf %130, %133 : vector<32x128xf32>
    %cst_45 = arith.constant dense<0.000000e+00> : vector<128xf32>
    %135 = vector.multi_reduction <add>, %134, %cst_45 [0] : vector<32x128xf32> to vector<128xf32>
    %136 = vector.shape_cast %135 : vector<128xf32> to vector<1x128xf32>
    %c0_46 = arith.constant 0 : index
    %c0_47 = arith.constant 0 : index
    %137 = vector.load %arg3[%c0_46, %c0_47] : memref<1x128xf32, #tpu.memory_space<vmem>>, vector<1x128xf32>
    tpu.vector_store %arg3[%c0_46, %c0_47], %136 {strides = array<i32>} : memref<1x128xf32, #tpu.memory_space<vmem>>, vector<1x128xf32>,
    return
  }
  func.func @transform_0(%arg0: i32) -> (i32, i32) {
    %c0_i32 = arith.constant 0 : i32
    %c0_i32_0 = arith.constant 0 : i32
    %c0_i32_1 = arith.constant 0 : i32
    return %c0_i32, %c0_i32_0 : i32, i32
  }
  func.func @transform_1(%arg0: i32) -> (i32, i32) {
    %c0_i32 = arith.constant 0 : i32
    %c0_i32_0 = arith.constant 0 : i32
    return %arg0, %c0_i32 : i32, i32
  }
  func.func @transform_2(%arg0: i32) -> (i32, i32) {
    %c0_i32 = arith.constant 0 : i32
    %c0_i32_0 = arith.constant 0 : i32
    return %arg0, %c0_i32 : i32, i32
  }
}

</mosaic_0001>

<bundles_post_ra>
// kernel: superloss_forward.1
= control target key start
LH: loop header
LB: loop body
LE: loop exit
PB: predicated region body
PF: predicated region fallthrough
CT: control target
= control target key end

     0   :  { %v525_v0 = vmov 0   ;;  %s866_s0 = inlined_call_operand.<no memory space> [shape: f32[1,1], index: 0, kind: input, shape index: {}]   ;;  %s867_s1 = inlined_call_operand.vmem [shape: f32[32,128], index: 1, kind: input, shape index: {}]   ;;  %s868_s2 = inlined_call_operand.vmem [shape: f32[1,128], index: 2, kind: output, shape index: {}]  }
   0x1   :  { %452 = vset.pattern.permute.xlu0 %v525_v0  ;;  %v7_v1 = vstv %s866_s0  ;;  %v13_v3 = vld [vmem:[%s867_s1] sm:$0xff]  ;;  %v14_v4 = vld [vmem:[%s867_s1 + $0x8] sm:$0xff]  ;;  %v15_v5 = vld [vmem:[%s867_s1 + $0x10] sm:$0xff] }
   0x2   :  { %8 = vst [vmem:[#allocation2] sm:$0x1] %v7_v1  ;;  %v16_v6 = vld [vmem:[%s867_s1 + $0x18] sm:$0xff] }
   0x9   :  { %v449_v2 = vld [vmem:[#allocation2] ss:$0 sm:$0xff] }
   0xa   :  { %24 = vperm.xlu0 %452, %v449_v2  }
  0x89   :  { %v25_v7 = vpop.permute.xlu0 %24 }
  0x8a   :  { %v557_v8 = vsub.f32 %v13_v3, %v25_v7  ;;  %v559_v9 = vsub.f32 %v14_v4, %v25_v7  ;;  %v561_v10 = vsub.f32 %v15_v5, %v25_v7  ;;  %v563_v11 = vsub.f32 %v16_v6, %v25_v7 }
  0x8c   :  { %v31_v12 = vmul.f32 0.5, %v557_v8  ;;  %v32_v13 = vmul.f32 0.5, %v559_v9  ;;  %v33_v14 = vmul.f32 0.5, %v561_v10  ;;  %v34_v15 = vmul.f32 0.5, %v563_v11 }
  0x8e   :  { %v569_v16 = vmax.f32 %v31_v12, -0.36787945  ;;  %v571_v17 = vmax.f32 %v32_v13, -0.36787945  ;;  %v573_v18 = vmax.f32 %v33_v14, -0.36787945 }
  0x8f   :  { %v575_v19 = vmax.f32 %v34_v15, -0.36787945 }
  0x90   :  { %v39_v20 = vmul.f32 2.7182817, %v569_v16  ;;  %v40_v21 = vmul.f32 2.7182817, %v571_v17  ;;  %v41_v22 = vmul.f32 2.7182817, %v573_v18 }
  0x91   :  { %v42_v23 = vmul.f32 2.7182817, %v575_v19  ;;  %v111_v36 = vadd.f32 1.0, %v569_v16  ;;  %v112_v37 = vadd.f32 1.0, %v571_v17  ;;  %v113_v38 = vadd.f32 1.0, %v573_v18 }
  0x92   :  { %v43_v24 = vadd.f32 1.0, %v39_v20  ;;  %v44_v25 = vadd.f32 1.0, %v40_v21  ;;  %v45_v26 = vadd.f32 1.0, %v41_v22  ;;  %v114_v39 = vadd.f32 1.0, %v575_v19 }
  0x93   :  { %v46_v27 = vadd.f32 1.0, %v42_v23  ;;  %v115_v40 = vmax.f32 %v111_v36, 1e-30  ;;  %v116_v41 = vmax.f32 %v112_v37, 1e-30  ;;  %vm107_vm8 = vcmp.lt.f32.partialorder %v569_v16, 0.0 }
  0x94   :  { %v47_v28 = vmul.f32 2.0, %v43_v24  ;;  %v48_v29 = vmul.f32 2.0, %v44_v25  ;;  %v49_v30 = vmul.f32 2.0, %v45_v26  ;;  %v117_v42 = vmax.f32 %v113_v38, 1e-30 }
  0x95   :  { %v50_v31 = vmul.f32 2.0, %v46_v27  ;;  %v118_v43 = vmax.f32 %v114_v39, 1e-30  ;;  %vm108_vm9 = vcmp.lt.f32.partialorder %v571_v17, 0.0  ;;  %vm109_vm10 = vcmp.lt.f32.partialorder %v573_v18, 0.0 }
  0x96   :  { %v581_v32 = vmax.f32 %v47_v28, 0.0  ;;  %v583_v33 = vmax.f32 %v48_v29, 0.0  ;;  %v585_v34 = vmax.f32 %v49_v30, 0.0  ;;  %vm110_vm11 = vcmp.lt.f32.partialorder %v575_v19, 0.0 }
  0x97   :  { %v587_v35 = vmax.f32 %v50_v31, 0.0 }
  0x98   :  { %453 = vrsqrt.f32 %v581_v32  ;;  %vm57_vm0 = vcmp.eq.f32.partialorder %v581_v32, inf  ;;  %vm59_vm1 = vcmp.eq.f32.partialorder %v581_v32, 0.0  ;;  %v60_v45 = vand.u32 2147483648, %v581_v32 }
  0x99   :  { %455 = vrsqrt.f32 %v583_v33  ;;  %vm64_vm2 = vcmp.eq.f32.partialorder %v583_v33, inf  ;;  %vm66_vm3 = vcmp.eq.f32.partialorder %v583_v33, 0.0  ;;  %v67_v48 = vand.u32 2147483648, %v583_v33 }
  0x9a   :  { %457 = vrsqrt.f32 %v585_v34  ;;  %vm71_vm4 = vcmp.eq.f32.partialorder %v585_v34, inf  ;;  %vm73_vm5 = vcmp.eq.f32.partialorder %v585_v34, 0.0  ;;  %v74_v51 = vand.u32 2147483648, %v585_v34 }
  0x9b   :  { %459 = vrsqrt.f32 %v587_v35  ;;  %vm78_vm6 = vcmp.eq.f32.partialorder %v587_v35, inf  ;;  %v81_v55 = vand.u32 2147483648, %v587_v35  ;;  %vm80_vm7 = vcmp.eq.f32.partialorder %v587_v35, 0.0 }
  0x9c   :  { %461 = vlog2.f32 %v115_v40 }
  0x9d   :  { %463 = vlog2.f32 %v116_v41 }
  0x9e   :  { %465 = vlog2.f32 %v117_v42 }
  0x9f   :  { %467 = vlog2.f32 %v118_v43 }
  0xa2   :  { %v454_v44 = vpop.eup %453 }
  0xa3   :  { %v456_v46 = vpop.eup %455  ;;  %v56_v47 = vmul.f32 %v454_v44, %v581_v32 }
  0xa4   :  { %v458_v49 = vpop.eup %457  ;;  %v63_v50 = vmul.f32 %v456_v46, %v583_v33 }
  0xa5   :  { %v460_v52 = vpop.eup %459  ;;  %v58_v53 = vsel %vm57_vm0, %v581_v32, %v56_v47  ;;  %v70_v54 = vmul.f32 %v458_v49, %v585_v34 }
  0xa6   :  { %v61_v56 = vsel %vm59_vm1, %v60_v45, %v58_v53  ;;  %v65_v57 = vsel %vm64_vm2, %v583_v33, %v63_v50  ;;  %v77_v58 = vmul.f32 %v460_v52, %v587_v35  ;;  %v462_v6 = vpop.eup %461 }
  0xa7   :  { %v68_v59 = vsel %vm66_vm3, %v67_v48, %v65_v57  ;;  %v72_v60 = vsel %vm71_vm4, %v585_v34, %v70_v54  ;;  %v83_v61 = vmul.f32 0.15277778, %v61_v56  ;;  %v464_v23 = vpop.eup %463  ;;  %v120_v36 = vmul.f32 0.6931472, %v462_v6 }
  0xa8   :  { %v75_v62 = vsel %vm73_vm5, %v74_v51, %v72_v60  ;;  %v79_v63 = vsel %vm78_vm6, %v587_v35, %v77_v58  ;;  %v84_v0 = vmul.f32 0.15277778, %v68_v59  ;;  %v466_v26 = vpop.eup %465  ;;  %v122_v39 = vmul.f32 0.6931472, %v464_v23 }
  0xa9   :  { %v82_v1 = vsel %vm80_vm7, %v81_v55, %v79_v63  ;;  %v85_v2 = vmul.f32 0.15277778, %v75_v62  ;;  %v87_v3 = vadd.f32 -0.33333334, %v83_v61  ;;  %v468_v29 = vpop.eup %467  ;;  %v124_v41 = vmul.f32 0.6931472, %v466_v26 }
  0xaa   :  { %v86_v4 = vmul.f32 0.15277778, %v82_v1  ;;  %v88_v5 = vadd.f32 -0.33333334, %v84_v0  ;;  %v126_v44 = vmul.f32 0.6931472, %v468_v29 }
  0xab   :  { %v89_v7 = vadd.f32 -0.33333334, %v85_v2  ;;  %v91_v12 = vmul.f32 %v87_v3, %v61_v56 }
  0xac   :  { %v90_v13 = vadd.f32 -0.33333334, %v86_v4  ;;  %v92_v14 = vmul.f32 %v88_v5, %v68_v59 }
  0xad   :  { %v93_v15 = vmul.f32 %v89_v7, %v75_v62  ;;  %v95_v20 = vadd.f32 1.0, %v91_v12 }
  0xae   :  { %v94_v21 = vmul.f32 %v90_v13, %v82_v1  ;;  %v96_v22 = vadd.f32 1.0, %v92_v14 }
  0xaf   :  { %v97_v24 = vadd.f32 1.0, %v93_v15  ;;  %v99_v25 = vmul.f32 %v95_v20, %v61_v56 }
  0xb0   :  { %v98_v27 = vadd.f32 1.0, %v94_v21  ;;  %v100_v28 = vmul.f32 %v96_v22, %v68_v59 }
  0xb1   :  { %v101_v30 = vmul.f32 %v97_v24, %v75_v62  ;;  %v627_v31 = vadd.f32 -1.0, %v99_v25 }
  0xb2   :  { %v102_v37 = vmul.f32 %v98_v27, %v82_v1  ;;  %v630_v38 = vadd.f32 -1.0, %v100_v28 }
  0xb3   :  { %v633_v40 = vadd.f32 -1.0, %v101_v30  ;;  %v637_v42 = vsel %vm107_vm8, %v627_v31, %v120_v36 }
  0xb4   :  { %v639_v43 = vadd.f32 -1.0, %v102_v37  ;;  %v642_v45 = vsel %vm108_vm9, %v630_v38, %v122_v39  ;;  %v135_v46 = vmul.f32 1.442695, %v637_v42  ;;  %v656_v54 = vadd.f32 1.0, %v637_v42 }
  0xb5   :  { %v647_v47 = vsel %vm109_vm10, %v633_v40, %v124_v41  ;;  %v137_v48 = vmul.f32 1.442695, %v642_v45  ;;  %v659_v55 = vadd.f32 1.0, %v642_v45  ;;  %v175_v15 = vadd.f32 2.0, %v637_v42 }
  0xb6   :  { %v651_v49 = vsel %vm110_vm11, %v639_v43, %v126_v44  ;;  %469 = vpow2.f32 %v135_v46  ;;  %v139_v50 = vmul.f32 1.442695, %v647_v47  ;;  %v663_v59 = vadd.f32 1.0, %v647_v47 }
  0xb7   :  { %471 = vpow2.f32 %v137_v48  ;;  %v141_v51 = vmul.f32 1.442695, %v651_v49  ;;  %v666_v60 = vadd.f32 1.0, %v651_v49  ;;  %v176_v23 = vadd.f32 2.0, %v642_v45 }
  0xb8   :  { %473 = vpow2.f32 %v139_v50  ;;  %v177_v25 = vadd.f32 2.0, %v647_v47  ;;  %v178_v26 = vadd.f32 2.0, %v651_v49  ;;  %v526_v50 = vmov 1e-20  }
  0xb9   :  { %475 = vpow2.f32 %v141_v51 }
  0xc0   :  { %v470_v52 = vpop.eup %469 }
  0xc1   :  { %v472_v53 = vpop.eup %471  ;;  %v147_v56 = vmul.f32 %v470_v52, %v637_v42  ;;  %v163_v57 = vmul.f32 2.0, %v470_v52 }
  0xc2   :  { %v474_v58 = vpop.eup %473  ;;  %v148_v61 = vmul.f32 %v472_v53, %v642_v45  ;;  %v164_v62 = vmul.f32 2.0, %v472_v53 }
  0xc3   :  { %v476_v63 = vpop.eup %475  ;;  %v149_v0 = vmul.f32 %v474_v58, %v647_v47  ;;  %v151_v1 = vsub.f32 %v147_v56, %v569_v16  ;;  %v165_v2 = vmul.f32 2.0, %v474_v58  ;;  %v167_v3 = vmul.f32 %v163_v57, %v656_v54 }
  0xc4   :  { %v150_v4 = vmul.f32 %v476_v63, %v651_v49  ;;  %v152_v5 = vsub.f32 %v148_v61, %v571_v17  ;;  %v166_v6 = vmul.f32 2.0, %v476_v63  ;;  %v168_v7 = vmul.f32 %v164_v62, %v659_v55 }
  0xc5   :  { %v153_v12 = vsub.f32 %v149_v0, %v573_v18  ;;  %v169_v13 = vmul.f32 %v165_v2, %v663_v59  ;;  %v171_v14 = vmul.f32 %v167_v3, %v656_v54  ;;  %v179_v27 = vmul.f32 %v175_v15, %v151_v1 }
  0xc6   :  { %v154_v20 = vsub.f32 %v150_v4, %v575_v19  ;;  %v170_v21 = vmul.f32 %v166_v6, %v666_v60  ;;  %v172_v22 = vmul.f32 %v168_v7, %v659_v55  ;;  %v180_v29 = vmul.f32 %v176_v23, %v152_v5 }
  0xc7   :  { %v173_v24 = vmul.f32 %v169_v13, %v663_v59  ;;  %v181_v30 = vmul.f32 %v177_v25, %v153_v12  ;;  %v183_v37 = vsub.f32 %v171_v14, %v179_v27  ;;  %v155_v2 = vmul.f32 2.0, %v151_v1 }
  0xc8   :  { %v174_v28 = vmul.f32 %v170_v21, %v666_v60  ;;  %v182_v36 = vmul.f32 %v178_v26, %v154_v20  ;;  %v184_v39 = vsub.f32 %v172_v22, %v180_v29  ;;  %v156_v3 = vmul.f32 2.0, %v152_v5 }
  0xc9   :  { %v185_v41 = vsub.f32 %v173_v24, %v181_v30  ;;  %v187_v46 = vand.u32 2147483647, %v183_v37  ;;  %vm195_vm12 = vcmp.lt.f32.partialorder %v183_v37, 0.0  ;;  %v157_v4 = vmul.f32 2.0, %v153_v12 }
  0xca   :  { %v186_v44 = vsub.f32 %v174_v28, %v182_v36  ;;  %v188_v48 = vand.u32 2147483647, %v184_v39  ;;  %vm196_vm13 = vcmp.lt.f32.partialorder %v184_v39, 0.0  ;;  %v199_v51 = vsel %vm195_vm12, -1e-20, %v526_v50 }
  0xcb   :  { %v189_v52 = vand.u32 2147483647, %v185_v41  ;;  %vm191_vm14 = vcmp.lt.f32.partialorder %v187_v46, 1e-20  ;;  %vm197_vm0 = vcmp.lt.f32.partialorder %v185_v41, 0.0  ;;  %v158_v6 = vmul.f32 2.0, %v154_v20 }
  0xcc   :  { %v190_v53 = vand.u32 2147483647, %v186_v44  ;;  %vm192_vm15 = vcmp.lt.f32.partialorder %v188_v48, 1e-20  ;;  %vm198_vm1 = vcmp.lt.f32.partialorder %v186_v44, 0.0  ;;  %v203_v58 = vsel %vm191_vm14, %v199_v51, %v183_v37 }
  0xcd   :  { %v200_v56 = vsel %vm196_vm13, -1e-20, %v526_v50  ;;  %vm193_vm2 = vcmp.lt.f32.partialorder %v189_v52, 1e-20  ;;  %v201_v57 = vsel %vm197_vm0, -1e-20, %v526_v50  ;;  %477 = vrcp.f32 %v203_v58 }
  0xce   :  { %vm194_vm3 = vcmp.lt.f32.partialorder %v190_v53, 1e-20  ;;  %v202_v61 = vsel %vm198_vm1, -1e-20, %v526_v50  ;;  %v204_v62 = vsel %vm192_vm15, %v200_v56, %v184_v39  ;;  %v205_v63 = vsel %vm193_vm2, %v201_v57, %v185_v41 }
  0xcf   :  { %v206_v0 = vsel %vm194_vm3, %v202_v61, %v186_v44  ;;  %479 = vrcp.f32 %v204_v62  ;;  %v159_v7 = vmul.f32 %v155_v2, %v656_v54  ;;  %v160_v14 = vmul.f32 %v156_v3, %v659_v55 }
  0xd0   :  { %481 = vrcp.f32 %v205_v63  ;;  %v161_v21 = vmul.f32 %v157_v4, %v663_v59  ;;  %v162_v24 = vmul.f32 %v158_v6, %v666_v60 }
  0xd1   :  { %483 = vrcp.f32 %v206_v0 }
  0xd7   :  { %v478_v13 = vpop.eup %477 }
  0xd8   :  { %v208_v22 = vmul.f32 %v478_v13, %v159_v7 }
  0xd9   :  { %v480_v15 = vpop.eup %479 }
  0xda   :  { %v482_v23 = vpop.eup %481  ;;  %v210_v25 = vmul.f32 %v480_v15, %v160_v14  ;;  %v696_v1 = vsub.f32 %v637_v42, %v208_v22 }
  0xdb   :  { %v484_v26 = vpop.eup %483  ;;  %v212_v27 = vmul.f32 %v482_v23, %v161_v21 }
  0xdc   :  { %v214_v5 = vmul.f32 %v484_v26, %v162_v24  ;;  %v699_v12 = vsub.f32 %v642_v45, %v210_v25  ;;  %v219_v55 = vmul.f32 1.442695, %v696_v1  ;;  %v259_v2 = vadd.f32 2.0, %v696_v1 }
  0xdd   :  { %v702_v54 = vsub.f32 %v647_v47, %v212_v27  ;;  %v712_v47 = vadd.f32 1.0, %v696_v1 }
  0xde   :  { %v706_v59 = vsub.f32 %v651_v49, %v214_v5  ;;  %v221_v60 = vmul.f32 1.442695, %v699_v12  ;;  %485 = vpow2.f32 %v219_v55  ;;  %v715_v29 = vadd.f32 1.0, %v699_v12 }
  0xdf   :  { %v223_v20 = vmul.f32 1.442695, %v702_v54  ;;  %v719_v37 = vadd.f32 1.0, %v702_v54  ;;  %v260_v7 = vadd.f32 2.0, %v699_v12  ;;  %v261_v14 = vadd.f32 2.0, %v702_v54 }
  0xe0   :  { %487 = vpow2.f32 %v221_v60  ;;  %v225_v42 = vmul.f32 1.442695, %v706_v59  ;;  %v722_v39 = vadd.f32 1.0, %v706_v59  ;;  %v262_v15 = vadd.f32 2.0, %v706_v59 }
  0xe1   :  { %489 = vpow2.f32 %v223_v20 }
  0xe2   :  { %491 = vpow2.f32 %v225_v42 }
  0xe8   :  { %v486_v45 = vpop.eup %485 }
  0xe9   :  { %v231_v49 = vmul.f32 %v486_v45, %v696_v1  ;;  %v247_v30 = vmul.f32 2.0, %v486_v45 }
  0xea   :  { %v488_v28 = vpop.eup %487 }
  0xeb   :  { %v490_v36 = vpop.eup %489  ;;  %v232_v41 = vmul.f32 %v488_v28, %v699_v12  ;;  %v248_v44 = vmul.f32 2.0, %v488_v28  ;;  %v235_v51 = vsub.f32 %v231_v49, %v569_v16  ;;  %v251_v53 = vmul.f32 %v247_v30, %v712_v47 }
  0xec   :  { %v492_v46 = vpop.eup %491  ;;  %v233_v48 = vmul.f32 %v490_v36, %v702_v54  ;;  %v249_v52 = vmul.f32 2.0, %v490_v36 }
  0xed   :  { %v234_v56 = vmul.f32 %v492_v46, %v706_v59  ;;  %v236_v57 = vsub.f32 %v232_v41, %v571_v17  ;;  %v250_v58 = vmul.f32 2.0, %v492_v46  ;;  %v252_v61 = vmul.f32 %v248_v44, %v715_v29 }
  0xee   :  { %v237_v62 = vsub.f32 %v233_v48, %v573_v18  ;;  %v253_v63 = vmul.f32 %v249_v52, %v719_v37  ;;  %v255_v0 = vmul.f32 %v251_v53, %v712_v47  ;;  %v263_v21 = vmul.f32 %v259_v2, %v235_v51 }
  0xef   :  { %v238_v3 = vsub.f32 %v234_v56, %v575_v19  ;;  %v254_v4 = vmul.f32 %v250_v58, %v722_v39  ;;  %v256_v6 = vmul.f32 %v252_v61, %v715_v29  ;;  %v264_v23 = vmul.f32 %v260_v7, %v236_v57 }
  0xf0   :  { %v257_v13 = vmul.f32 %v253_v63, %v719_v37  ;;  %v265_v24 = vmul.f32 %v261_v14, %v237_v62  ;;  %v267_v26 = vsub.f32 %v255_v0, %v263_v21  ;;  %v239_v52 = vmul.f32 2.0, %v235_v51 }
  0xf1   :  { %v258_v22 = vmul.f32 %v254_v4, %v722_v39  ;;  %v266_v25 = vmul.f32 %v262_v15, %v238_v3  ;;  %v268_v27 = vsub.f32 %v256_v6, %v264_v23  ;;  %v240_v53 = vmul.f32 2.0, %v236_v57 }
  0xf2   :  { %v269_v5 = vsub.f32 %v257_v13, %v265_v24  ;;  %v271_v60 = vand.u32 2147483647, %v267_v26  ;;  %vm279_vm4 = vcmp.lt.f32.partialorder %v267_v26, 0.0  ;;  %v241_v56 = vmul.f32 2.0, %v237_v62 }
  0xf3   :  { %v270_v55 = vsub.f32 %v258_v22, %v266_v25  ;;  %v272_v20 = vand.u32 2147483647, %v268_v27  ;;  %vm280_vm5 = vcmp.lt.f32.partialorder %v268_v27, 0.0  ;;  %v283_v42 = vsel %vm279_vm4, -1e-20, %v526_v50 }
  0xf4   :  { %v273_v45 = vand.u32 2147483647, %v269_v5  ;;  %vm275_vm6 = vcmp.lt.f32.partialorder %v271_v60, 1e-20  ;;  %vm281_vm8 = vcmp.lt.f32.partialorder %v269_v5, 0.0  ;;  %v242_v58 = vmul.f32 2.0, %v238_v3 }
  0xf5   :  { %v274_v28 = vand.u32 2147483647, %v270_v55  ;;  %vm276_vm7 = vcmp.lt.f32.partialorder %v272_v20, 1e-20  ;;  %vm282_vm9 = vcmp.lt.f32.partialorder %v270_v55, 0.0  ;;  %v287_v36 = vsel %vm275_vm6, %v283_v42, %v267_v26 }
  0xf6   :  { %v284_v49 = vsel %vm280_vm5, -1e-20, %v526_v50  ;;  %vm277_vm10 = vcmp.lt.f32.partialorder %v273_v45, 1e-20  ;;  %v285_v30 = vsel %vm281_vm8, -1e-20, %v526_v50  ;;  %493 = vrcp.f32 %v287_v36 }
  0xf7   :  { %vm278_vm11 = vcmp.lt.f32.partialorder %v274_v28, 1e-20  ;;  %v286_v41 = vsel %vm282_vm9, -1e-20, %v526_v50  ;;  %v288_v44 = vsel %vm276_vm7, %v284_v49, %v268_v27  ;;  %v289_v46 = vsel %vm277_vm10, %v285_v30, %v269_v5 }
  0xf8   :  { %v290_v48 = vsel %vm278_vm11, %v286_v41, %v270_v55  ;;  %495 = vrcp.f32 %v288_v44  ;;  %v243_v61 = vmul.f32 %v239_v52, %v712_v47  ;;  %v244_v0 = vmul.f32 %v240_v53, %v715_v29 }
  0xf9   :  { %497 = vrcp.f32 %v289_v46  ;;  %v245_v4 = vmul.f32 %v241_v56, %v719_v37  ;;  %v246_v13 = vmul.f32 %v242_v58, %v722_v39  ;;  %v391_v22 = vand.u32 2147483647, %v569_v16 }
  0xfa   :  { %499 = vrcp.f32 %v290_v48  ;;  %vm131_vm8 = vcmp.lt.f32.partialorder %v581_v32, 0.001  ;;  %vm132_vm9 = vcmp.lt.f32.partialorder %v583_v33, 0.001  ;;  %vm133_vm10 = vcmp.lt.f32.partialorder %v585_v34, 0.001 }
  0xfb   :  { %vm803_vm12 = vcmp.lt.f32.partialorder %v391_v22, 1e-06  ;;  %vm134_vm11 = vcmp.lt.f32.partialorder %v587_v35, 0.001 }
 0x100   :  { %v494_v63 = vpop.eup %493 }
 0x101   :  { %v292_v6 = vmul.f32 %v494_v63, %v243_v61 }
 0x102   :  { %v496_v2 = vpop.eup %495 }
 0x103   :  { %v498_v7 = vpop.eup %497  ;;  %v294_v14 = vmul.f32 %v496_v2, %v244_v0  ;;  %v752_v51 = vsub.f32 %v696_v1, %v292_v6 }
 0x104   :  { %v500_v15 = vpop.eup %499  ;;  %v296_v21 = vmul.f32 %v498_v7, %v245_v4 }
 0x105   :  { %v298_v57 = vmul.f32 %v500_v15, %v246_v13  ;;  %v755_v62 = vsub.f32 %v699_v12, %v294_v14  ;;  %v303_v29 = vmul.f32 1.442695, %v752_v51  ;;  %v770_v24 = vadd.f32 1.0, %v752_v51 }
 0x106   :  { %v758_v47 = vsub.f32 %v702_v54, %v296_v21  ;;  %v392_v54 = vand.u32 2147483647, %v571_v17  ;;  %v343_v56 = vadd.f32 2.0, %v752_v51 }
 0x107   :  { %v762_v37 = vsub.f32 %v706_v59, %v298_v57  ;;  %v305_v39 = vmul.f32 1.442695, %v755_v62  ;;  %501 = vpow2.f32 %v303_v29  ;;  %v773_v59 = vadd.f32 1.0, %v755_v62 }
 0x108   :  { %v307_v3 = vmul.f32 1.442695, %v758_v47  ;;  %v777_v5 = vadd.f32 1.0, %v758_v47  ;;  %v344_v0 = vadd.f32 2.0, %v755_v62  ;;  %v345_v4 = vadd.f32 2.0, %v758_v47 }
 0x109   :  { %503 = vpow2.f32 %v305_v39  ;;  %v309_v1 = vmul.f32 1.442695, %v762_v37  ;;  %v780_v55 = vadd.f32 1.0, %v762_v37  ;;  %v346_v6 = vadd.f32 2.0, %v762_v37 }
 0x10a   :  { %505 = vpow2.f32 %v307_v3  ;;  %v393_v29 = vand.u32 2147483647, %v573_v18  ;;  %v394_v3 = vand.u32 2147483647, %v575_v19  ;;  %vm807_vm13 = vcmp.lt.f32.partialorder %v392_v54, 1e-06 }
 0x10b   :  { %507 = vpow2.f32 %v309_v1 }
 0x10c   :  { %vm815_vm6 = vcmp.lt.f32.partialorder %v393_v29, 1e-06  ;;  %vm819_vm7 = vcmp.lt.f32.partialorder %v394_v3, 1e-06 }
 0x111   :  { %v502_v12 = vpop.eup %501 }
 0x112   :  { %v315_v25 = vmul.f32 %v502_v12, %v752_v51  ;;  %v331_v26 = vmul.f32 2.0, %v502_v12 }
 0x113   :  { %v504_v23 = vpop.eup %503 }
 0x114   :  { %v506_v27 = vpop.eup %505  ;;  %v316_v60 = vmul.f32 %v504_v23, %v755_v62  ;;  %v332_v20 = vmul.f32 2.0, %v504_v23  ;;  %v319_v28 = vsub.f32 %v315_v25, %v569_v16  ;;  %v335_v30 = vmul.f32 %v331_v26, %v770_v24 }
 0x115   :  { %v508_v42 = vpop.eup %507  ;;  %v317_v45 = vmul.f32 %v506_v27, %v758_v47  ;;  %v333_v49 = vmul.f32 2.0, %v506_v27 }
 0x116   :  { %v318_v36 = vmul.f32 %v508_v42, %v762_v37  ;;  %v320_v41 = vsub.f32 %v316_v60, %v571_v17  ;;  %v334_v44 = vmul.f32 2.0, %v508_v42  ;;  %v336_v46 = vmul.f32 %v332_v20, %v773_v59 }
 0x117   :  { %v321_v48 = vsub.f32 %v317_v45, %v573_v18  ;;  %v337_v52 = vmul.f32 %v333_v49, %v777_v5  ;;  %v339_v53 = vmul.f32 %v335_v30, %v770_v24  ;;  %v347_v7 = vmul.f32 %v343_v56, %v319_v28 }
 0x118   :  { %v322_v58 = vsub.f32 %v318_v36, %v575_v19  ;;  %v338_v61 = vmul.f32 %v334_v44, %v780_v55  ;;  %v340_v63 = vmul.f32 %v336_v46, %v773_v59  ;;  %v348_v14 = vmul.f32 %v344_v0, %v320_v41 }
 0x119   :  { %v341_v2 = vmul.f32 %v337_v52, %v777_v5  ;;  %v349_v15 = vmul.f32 %v345_v4, %v321_v48  ;;  %v351_v57 = vsub.f32 %v339_v53, %v347_v7  ;;  %v399_v53 = vsel %vm803_vm12, 1.0, %v569_v16 }
 0x11a   :  { %v342_v13 = vmul.f32 %v338_v61, %v780_v55  ;;  %v350_v21 = vmul.f32 %v346_v6, %v322_v58  ;;  %v352_v39 = vsub.f32 %v340_v63, %v348_v14  ;;  %v401_v56 = vsel %vm815_vm6, 1.0, %v573_v18 }
 0x11b   :  { %v353_v23 = vsub.f32 %v341_v2, %v349_v15  ;;  %v355_v26 = vand.u32 2147483647, %v351_v57  ;;  %vm363_vm14 = vcmp.lt.f32.partialorder %v351_v57, 0.0  ;;  %v323_v61 = vmul.f32 2.0, %v319_v28 }
 0x11c   :  { %v354_v25 = vsub.f32 %v342_v13, %v350_v21  ;;  %v356_v27 = vand.u32 2147483647, %v352_v39  ;;  %vm364_vm15 = vcmp.lt.f32.partialorder %v352_v39, 0.0  ;;  %v367_v60 = vsel %vm363_vm14, -1e-20, %v526_v50 }
 0x11d   :  { %v357_v20 = vand.u32 2147483647, %v353_v23  ;;  %vm359_vm0 = vcmp.lt.f32.partialorder %v355_v26, 1e-20  ;;  %vm365_vm2 = vcmp.lt.f32.partialorder %v353_v23, 0.0  ;;  %v402_v63 = vsel %vm819_vm7, 1.0, %v575_v19 }
 0x11e   :  { %v358_v42 = vand.u32 2147483647, %v354_v25  ;;  %vm360_vm1 = vcmp.lt.f32.partialorder %v356_v27, 1e-20  ;;  %vm366_vm3 = vcmp.lt.f32.partialorder %v354_v25, 0.0  ;;  %v371_v45 = vsel %vm359_vm0, %v367_v60, %v351_v57 }
 0x11f   :  { %v368_v22 = vsel %vm364_vm15, -1e-20, %v526_v50  ;;  %vm361_vm4 = vcmp.lt.f32.partialorder %v357_v20, 1e-20  ;;  %v369_v54 = vsel %vm365_vm2, -1e-20, %v526_v50  ;;  %509 = vrcp.f32 %v371_v45 }
 0x120   :  { %vm362_vm5 = vcmp.lt.f32.partialorder %v358_v42, 1e-20  ;;  %v370_v49 = vsel %vm366_vm3, -1e-20, %v526_v50  ;;  %v372_v30 = vsel %vm360_vm1, %v368_v22, %v352_v39  ;;  %v373_v36 = vsel %vm361_vm4, %v369_v54, %v353_v23 }
 0x121   :  { %v374_v44 = vsel %vm362_vm5, %v370_v49, %v354_v25  ;;  %511 = vrcp.f32 %v372_v30  ;;  %v400_v50 = vsel %vm807_vm13, 1.0, %v571_v17  ;;  %v324_v0 = vmul.f32 2.0, %v320_v41 }
 0x122   :  { %513 = vrcp.f32 %v373_v36  ;;  %v325_v2 = vmul.f32 2.0, %v321_v48  ;;  %v326_v16 = vmul.f32 2.0, %v322_v58  ;;  %v327_v4 = vmul.f32 %v323_v61, %v770_v24 }
 0x123   :  { %515 = vrcp.f32 %v374_v44  ;;  %v328_v17 = vmul.f32 %v324_v0, %v773_v59 }
 0x124   :  { %517 = vrcp.f32 %v399_v53  ;;  %v329_v18 = vmul.f32 %v325_v2, %v777_v5  ;;  %v330_v14 = vmul.f32 %v326_v16, %v780_v55 }
 0x125   :  { %519 = vrcp.f32 %v400_v50 }
 0x126   :  { %521 = vrcp.f32 %v401_v56 }
 0x127   :  { %523 = vrcp.f32 %v402_v63 }
 0x129   :  { %v510_v6 = vpop.eup %509 }
 0x12a   :  { %v376_v28 = vmul.f32 %v510_v6, %v327_v4 }
 0x12b   :  { %v512_v7 = vpop.eup %511 }
 0x12c   :  { %v514_v13 = vpop.eup %513  ;;  %v378_v19 = vmul.f32 %v512_v7, %v328_v17  ;;  %v383_v48 = vsub.f32 %v752_v51, %v376_v28 }
 0x12d   :  { %v516_v15 = vpop.eup %515  ;;  %v380_v41 = vmul.f32 %v514_v13, %v329_v18 }
 0x12e   :  { %v382_v24 = vmul.f32 %v516_v15, %v330_v14  ;;  %v384_v58 = vsub.f32 %v755_v62, %v378_v19  ;;  %v518_v59 = vpop.eup %517  ;;  %v387_v55 = vsel %vm131_vm8, %v627_v31, %v383_v48 }
 0x12f   :  { %v385_v5 = vsub.f32 %v758_v47, %v380_v41  ;;  %v520_v21 = vpop.eup %519  ;;  %v403_v32 = vsub.f32 1.0, %v387_v55  ;;  %v408_v29 = vmul.f32 %v518_v59, %v387_v55  ;;  %v419_v23 = vsub.f32 0.0, %v387_v55 }
 0x130   :  { %v386_v57 = vsub.f32 %v762_v37, %v382_v24  ;;  %v388_v51 = vsel %vm132_vm9, %v630_v38, %v384_v58  ;;  %v522_v33 = vpop.eup %521 }
 0x131   :  { %v389_v39 = vsel %vm133_vm10, %v633_v40, %v385_v5  ;;  %v404_v62 = vsub.f32 1.0, %v388_v51  ;;  %v410_v3 = vmul.f32 %v520_v21, %v388_v51  ;;  %v524_v34 = vpop.eup %523  ;;  %v415_v31 = vsel %vm803_vm12, %v403_v32, %v408_v29 }
 0x132   :  { %v390_v35 = vsel %vm134_vm11, %v639_v43, %v386_v57  ;;  %v405_v25 = vsub.f32 1.0, %v389_v39  ;;  %v412_v47 = vmul.f32 %v522_v33, %v389_v39  ;;  %v420_v27 = vsub.f32 0.0, %v388_v51 }
 0x133   :  { %v406_v26 = vsub.f32 1.0, %v390_v35  ;;  %v414_v37 = vmul.f32 %v524_v34, %v390_v35  ;;  %v416_v38 = vsel %vm807_vm13, %v404_v62, %v410_v3  ;;  %v421_v60 = vsub.f32 0.0, %v389_v39 }
 0x134   :  { %v417_v40 = vsel %vm815_vm6, %v405_v25, %v412_v47  ;;  %v422_v20 = vsub.f32 0.0, %v390_v35  ;;  %v423_v42 = vmul.f32 %v415_v31, %v557_v8  ;;  %v424_v22 = vmul.f32 %v416_v38, %v559_v9 }
 0x135   :  { %v418_v43 = vsel %vm819_vm7, %v406_v26, %v414_v37  ;;  %v427_v1 = vmul.f32 %v419_v23, %v419_v23  ;;  %v425_v54 = vmul.f32 %v417_v40, %v561_v10  ;;  %v428_v45 = vmul.f32 %v420_v27, %v420_v27 }
 0x136   :  { %v429_v49 = vmul.f32 %v421_v60, %v421_v60  ;;  %v426_v30 = vmul.f32 %v418_v43, %v563_v11  ;;  %v430_v36 = vmul.f32 %v422_v20, %v422_v20 }
 0x137   :  { %v431_v12 = vadd.f32 %v427_v1, %v423_v42  ;;  %v432_v44 = vadd.f32 %v428_v45, %v424_v22 }
 0x138   :  { %v433_v46 = vadd.f32 %v429_v49, %v425_v54  ;;  %v434_v50 = vadd.f32 %v430_v36, %v426_v30 }
 0x139   :  { %v435_v53 = vadd.f32 %v432_v44, %v431_v12 }
 0x13b   :  { %v436_v56 = vadd.f32 %v435_v53, %v433_v46 }
 0x13d   :  { %v437_v8 = vadd.f32 %v436_v56, %v434_v50 }
 0x13f   :  { %v438_v61 = vrot.slane %v437_v8, 4 }
 0x141   :  { %v439_v52 = vadd.f32 %v438_v61, %v437_v8 }
 0x143   :  { %v440_v63 = vrot.slane %v439_v52, 2 }
 0x145   :  { %v441_v0 = vadd.f32 %v440_v63, %v439_v52 }
 0x147   :  { %v442_v9 = vrot.slane %v441_v0, 1 }
 0x149   :  { %v443_v2 = vadd.f32 %v442_v9, %v441_v0 }
 0x14b   :  { %444 = vst [vmem:[%s868_s2] sm:$0x1] %v443_v2 }

</bundles_post_ra>
